<compile_context>
chip_gen: v7x
topology: tpu7x:2x2x1
jax: 0.10.0
libtpu: 0.0.40
codegen_flags: <defaults>
</compile_context>

<pallas_src>
import functools

import jax
import jax.numpy as jnp
from jax.experimental import pallas as pl
from jax.experimental.pallas import tpu as pltpu


# Preferred lane-dense widths (multiples of 128) for the flat 2-D view.
_LANE_WIDTHS = (4096, 2048, 1024, 512, 256, 128)
# At most this many DMA chunks: >=2 lets v7x shard across both TensorCores,
# while keeping each DMA large (few descriptors ~= HBM roofline).
_MAX_CHUNKS = 8


def _lane_dense_2d(total: int) -> tuple[int, int]:
    """Pick a (rows, cols) metadata-only view of a flat contiguous array.

    Prefers cols = large multiple of 128 with rows >= 2 (so the copy can be
    chunked / core-sharded); falls back to a single row for ragged sizes.
    """
    for k in _LANE_WIDTHS:
        if total % k == 0 and total // k >= 2:
            return total // k, k
    for k in _LANE_WIDTHS:
        if total % k == 0:
            return total // k, k
    return 1, total


def _identity_dma_kernel(x_hbm, o_hbm, sem, *, chunk_rows: int):
    """Copy one row-chunk of the flat 2-D view with a single HBM->HBM DMA."""
    i = pl.program_id(0)
    start = pl.multiple_of(i * chunk_rows, chunk_rows)
    cp = pltpu.make_async_copy(
        x_hbm.at[pl.ds(start, chunk_rows), :],
        o_hbm.at[pl.ds(start, chunk_rows), :],
        sem,
    )
    cp.start()
    cp.wait()


def _identity_copy(x: jax.Array) -> jax.Array:
    """Materialized identity: fresh output buffer via direct HBM->HBM DMAs."""
    # Zero-size guard: nothing to copy, return a fresh empty buffer.
    if x.size == 0:
        return jnp.zeros(x.shape, x.dtype)

    total = int(x.size)
    rows, cols = _lane_dense_2d(total)
    x2 = x.reshape(rows, cols)  # metadata-only for a contiguous array

    # Split into a few equal row-chunks (one DMA per grid step).  A leading
    # "parallel" grid axis with >=2 blocks lets v7x's two TensorCores each
    # drive part of the memory-bound copy; v5e/v6e simply loop over it.
    num_chunks = 1
    for c in (_MAX_CHUNKS, 4, 2):
        if rows % c == 0 and rows >= c:
            num_chunks = c
            break
    chunk_rows = rows // num_chunks

    kernel = functools.partial(_identity_dma_kernel, chunk_rows=chunk_rows)

    y2 = pl.pallas_call(
        kernel,
        out_shape=jax.ShapeDtypeStruct((rows, cols), x2.dtype),
        grid=(num_chunks,),
        # Both operands stay in HBM: no auto-tiling, no VMEM pass-through.
        in_specs=[pl.BlockSpec(memory_space=pl.ANY)],
        out_specs=pl.BlockSpec(memory_space=pl.ANY),
        scratch_shapes=[pltpu.SemaphoreType.DMA(())],
        compiler_params=pltpu.CompilerParams(
            dimension_semantics=("parallel",),
        ),
    )(x2)

    # No slice, no astype: shape/dtype were never changed.
    return y2.reshape(x.shape)


def identity_pallas(x: jax.Array, *, materialize: bool = False) -> jax.Array:
    """Identity.forward(x).

    The optimal lowering of a pass-through is no kernel at all (zero HBM
    traffic), so by default the input is returned unchanged -- exactly what
    torch.nn.Identity does.  Note this aliases the input; pass
    materialize=True if a distinct output buffer is required, in which case a
    direct HBM->HBM DMA copy (above) is used.
    """
    if not materialize:
        return x
    return _identity_copy(x)


if __name__ == "__main__":
    key = jax.random.PRNGKey(0)
    # Small NCHW-like input consistent with typical usage of the module.
    x = jax.random.normal(key, (2, 4, 16, 16), dtype=jnp.float32)

    # Default forward: zero-cost pass-through (the real Identity semantics).
    y = jax.block_until_ready(identity_pallas(x))
    assert y.shape == x.shape and y.dtype == x.dtype
    assert bool(jnp.all(y == x)), "Identity (pass-through) output mismatch"

    # Explicit materialized path: HBM->HBM DMA copy, identical values.
    y_copy = jax.block_until_ready(identity_pallas(x, materialize=True))
    assert y_copy.shape == x.shape and y_copy.dtype == x.dtype
    assert bool(jnp.all(y_copy == x)), "Identity (DMA copy) output mismatch"

    # Unaligned size + sub-32-bit dtype: ragged fallback (single-row view,
    # one DMA), still no wrapper padding, slicing, or dtype changes.
    x_odd = jax.random.normal(jax.random.PRNGKey(0), (3, 5, 7, 19)).astype(jnp.bfloat16)
    y_odd = jax.block_until_ready(identity_pallas(x_odd, materialize=True))
    assert y_odd.shape == x_odd.shape and y_odd.dtype == x_odd.dtype
    assert bool(jnp.all(y_odd == x_odd)), "Identity (DMA copy, odd shape) mismatch"

    print("KERNEL_OK")
</pallas_src>

<mosaic_0001>
module attributes {stable_mosaic.version = 11 : i64} {
  func.func @_identity_dma_kernel(%arg0: i32, %arg1: memref<2x1024xf32, #tpu.memory_space<any>>, %arg2: memref<2x1024xf32, #tpu.memory_space<any>>, %arg3: memref<!tpu.dma_semaphore, #tpu.memory_space<semaphore_mem>>) attributes {dimension_semantics = [#tpu.dimension_semantics<parallel>], iteration_bounds = array<i64: 2>, scalar_prefetch = 0 : i64, scratch_operands = 1 : i64, tpu.core_type = #tpu.core_type<tc>, window_params = [{}, {}]} {
    %c1_i32 = arith.constant 1 : i32
    %0 = arith.muli %arg0, %c1_i32 : i32
    %1 = tpu.assume_multiple %0, 1 : i32
    %c0_i32 = arith.constant 0 : i32
    %2 = tpu.memref_slice %arg1[%1, %c0_i32] : memref<2x1024xf32, #tpu.memory_space<any>> -> memref<1x1024xf32, #tpu.memory_space<any>>
    %c0_i32_0 = arith.constant 0 : i32
    %3 = tpu.memref_slice %arg2[%1, %c0_i32_0] : memref<2x1024xf32, #tpu.memory_space<any>> -> memref<1x1024xf32, #tpu.memory_space<any>>
    tpu.enqueue_dma source(%2 : memref<1x1024xf32, #tpu.memory_space<any>>) target(%3 : memref<1x1024xf32, #tpu.memory_space<any>>) target_semaphore(%arg3 : memref<!tpu.dma_semaphore, #tpu.memory_space<semaphore_mem>>)
    %c0_i32_1 = arith.constant 0 : i32
    %4 = tpu.memref_slice %arg1[%1, %c0_i32_1] : memref<2x1024xf32, #tpu.memory_space<any>> -> memref<1x1024xf32, #tpu.memory_space<any>>
    %c0_i32_2 = arith.constant 0 : i32
    %5 = tpu.memref_slice %arg2[%1, %c0_i32_2] : memref<2x1024xf32, #tpu.memory_space<any>> -> memref<1x1024xf32, #tpu.memory_space<any>>
    tpu.wait_dma2 semaphore(%arg3 : memref<!tpu.dma_semaphore, #tpu.memory_space<semaphore_mem>>) src(%4 : memref<1x1024xf32, #tpu.memory_space<any>>) dst(%5 : memref<1x1024xf32, #tpu.memory_space<any>>)
    return
  }
}

</mosaic_0001>

<bundles_post_ra>
// kernel: tpu_custom_call.1
= control target key start
LH: loop header
LB: loop body
LE: loop exit
PB: predicated region body
PF: predicated region fallthrough
CT: control target
= control target key end

     0   :  { %s85_s6 = smov 0   ;;  %s110_s0 = inlined_call_operand.hbm [shape: f32[2,1024], index: 0, kind: input, shape index: {}]   ;;  %s111_s1 = inlined_call_operand.hbm [shape: f32[2,1024], index: 1, kind: output, shape index: {}]  }
   0x1 LB: > { %s13_s7 = sshrl.u32 %s87_s6, 1  ;;  %s14_s8 = sand.u32 1, %s87_s6   ;;  %s87_s6 = sphi %s85_s6, %s11_s6  }
   0x2   : > { %s62_s9 = sshll.u32 %s13_s7, 4  ;;  %s89_s11 = smov 32  }
   0x3   : > { %s16_s10 = sadd.s32 %s62_s9, %s14_s8  ;;  %33 = sst [smem:[#allocation4]] %s89_s11 }
   0x4   : > { %s63_s12 = sshll.u32 %s16_s10, 4  ;;  %35 = sst [smem:[#allocation4 + $0x1]] %s89_s11 }
   0x5   : > { %s18_s15 = scalar_lea.hbm %s110_s0, %s63_s12  ;;  %s20_s18 = scalar_lea.hbm %s111_s1, %s63_s12 }
   0x6   : > { %s90_s19 = smov 1   ;;  %s91_s20 = smov [#allocation2]  }
   0x7   : > { %37 = sst [smem:[#allocation4 + $0x2]] %s90_s19  ;;  %s92_s21 = smov [#allocation3]  }
   0x8   : > { %s93_s22 = smov 0  }
   0x9   : > { %39 = dma.general %s18_s15, 128, %s20_s18, %s91_s20, %s92_s21, [#allocation4], %s93_s22, 0  }
   0xa   : > { %83 = dma.done.wait [#allocation2], 128 }
   0xb   : > { %84 = vsyncadd [#allocation2], 4294967168  ;;  %s11_s6 = sadd.s32 1, %s87_s6  }
   0xc   : > { %p8_p0 = scmp.ge.s32.totalorder %s11_s6, 2  }
   0xe   :  { %10 = sbr.rel (!%p8_p0) target bundleno = 1 (0x1), region = 23 }
  0x15   :  { %43 = vsyncmov [#allocation2] }
  0x18   :  { %s44_s23 = vpop.sfrf %43 }
  0x19   :  { %p65_p1 = scmp.ne.s32.totalorder %s44_s23, 0 }
  0x1b   :  { %48 = shalt.err (%p65_p1)  }

</bundles_post_ra>
